<compile_context>
chip_gen: v6e
topology: v6e:2x2x1
jax: 0.10.0
libtpu: 0.0.40
codegen_flags: <defaults>
</compile_context>

<pallas_src>
import jax
import jax.numpy as jnp
from jax.experimental import pallas as pl
from jax.experimental.pallas import tpu as pltpu


def _round_up(n, m):
    return (n + m - 1) // m * m


def _cdiv(a, b):
    return -(-a // b)


def _mlp_kernel(x_ref, w1_ref, b1_ref, w2_ref, b2_ref, w3_ref, b3_ref, o_ref):
    # Layer 1: [TB, E] @ [E, H] + [1, H] -> ReLU   (MXU, f32 accumulation)
    h1 = jnp.dot(x_ref[...], w1_ref[...], preferred_element_type=jnp.float32)
    h1 = jnp.maximum(h1 + b1_ref[...].astype(jnp.float32), 0.0)
    # Layer 2: [TB, H] @ [H, H2] + [1, H2] -> ReLU.
    # h1 stays in f32 (bf16 weights upcast); compute is fully hidden under the x DMA.
    h2 = jnp.dot(h1, w2_ref[...].astype(jnp.float32),
                 preferred_element_type=jnp.float32)
    h2 = jnp.maximum(h2 + b2_ref[...].astype(jnp.float32), 0.0)
    # Layer 3 (out_features == 1): broadcast multiply + lane reduce on VPU/XLU.
    o = jnp.sum(h2 * w3_ref[...].astype(jnp.float32), axis=-1, keepdims=True)
    o_ref[...] = (o + b3_ref[0, 0]).astype(o_ref.dtype)


def _vmem_capacity_bytes():
    try:
        return int(pltpu.get_tpu_info().vmem_capacity_bytes)
    except Exception:
        return 64 * 1024 * 1024  # conservative fallback (v7x per-core VMEM)


def _pick_tile_b(batch, emb_dim, itemsize, x_budget_bytes, cap=8192):
    """Largest sublane-aligned batch tile whose double-buffered x stream fits."""
    if batch < 8:
        return batch                                   # single full-dim block
    tile = x_budget_bytes // (2 * emb_dim * itemsize)  # 2 = double buffering
    tile = max(8, (min(tile, cap, (batch // 8) * 8) // 8) * 8)
    if batch >= 16:
        # Guarantee >= 2 grid tiles so v7x megacore gets work for both TCs.
        tile = min(tile, _round_up(_cdiv(batch, 2), 8))
    return max(tile, 8)


def simple_dense_net_forward(x, params, *, tile_b=None, compute_dtype=jnp.bfloat16):
    """x: [B, emb_dim] (trailing dims flattened like the PyTorch module).
    Returns [B] float32 logits (eval-mode dropout == identity).

    compute_dtype: dtype the streamed x / weights are cast to at the boundary
    (default bf16 -> ~2x less HBM traffic on the memory-bound x stream; pass None
    to keep input dtypes). Accumulation is always f32. Note: if x arrives as f32
    from an external producer the cast is one extra HBM pass; ideally the producer
    emits bf16 or the cast fuses upstream under jit.
    """
    w1, b1, w2, b2, w3, b3 = params
    x = x.reshape(x.shape[0], -1)          # mirrors torch flatten(start_dim=1)
    if compute_dtype is not None:
        cast = lambda a: a.astype(compute_dtype)
        x, w1, b1, w2, b2, w3 = tuple(cast(a) for a in (x, w1, b1, w2, b2, w3))
    b3_smem = jnp.asarray(b3, jnp.float32).reshape(1, 1)   # scalar bias -> SMEM

    B, E = x.shape
    H = w1.shape[1]
    H2 = w2.shape[1]
    x_itemsize = jnp.dtype(x.dtype).itemsize
    param_bytes = sum(int(p.size) * jnp.dtype(p.dtype).itemsize
                      for p in (w1, b1, w2, b2, w3, b3_smem))

    # Generation-aware VMEM budget: target ~75% of physical VMEM for the whole
    # resident footprint (x double-buffer + params + output double-buffer).
    vmem_cap = _vmem_capacity_bytes()
    total_budget = (vmem_cap * 3) // 4
    x_budget = total_budget - 2 * param_bytes - 2 * 8192 * 4 - (1 << 20)
    x_budget = max(x_budget, 2 * 8 * E * x_itemsize)

    if tile_b is None:
        tile_b = _pick_tile_b(B, E, x_itemsize, x_budget)
    else:
        tile_b = B if B < 8 else max(8, min((tile_b // 8) * 8, (B // 8) * 8))
    num_tiles = _cdiv(B, tile_b)

    resident = lambda i: (0, 0)   # same block every step -> stays VMEM-resident
    cost = pl.CostEstimate(
        flops=2 * B * (E * H + H * H2 + H2),
        transcendentals=0,
        bytes_accessed=B * E * x_itemsize + param_bytes + B * 4,
    )

    out = pl.pallas_call(
        _mlp_kernel,
        out_shape=jax.ShapeDtypeStruct((B, 1), jnp.float32),
        grid=(num_tiles,),
        in_specs=[
            # Streamed, double-buffered batch tile. Ragged tails are handled by
            # Pallas boundary blocks (padded reads, masked writes) -- no jnp.pad.
            pl.BlockSpec((tile_b, E), lambda i: (i, 0)),
            pl.BlockSpec((E, H), resident),
            pl.BlockSpec((1, H), resident),
            pl.BlockSpec((H, H2), resident),
            pl.BlockSpec((1, H2), resident),
            pl.BlockSpec((1, H2), resident),                    # w3 stored [1, H2]
            pl.BlockSpec(memory_space=pltpu.MemorySpace.SMEM),  # b3 scalar bias
        ],
        out_specs=pl.BlockSpec((tile_b, 1), lambda i: (i, 0)),
        compiler_params=pltpu.CompilerParams(
            dimension_semantics=("parallel",),   # v7x megacore; no-op on v5e/v6e
            vmem_limit_bytes=int(vmem_cap * 0.85),
        ),
        cost_estimate=cost,
    )(x, w1, b1, w2, b2, w3, b3_smem)
    return out[:, 0]   # squeeze(1) -> [B]


def init_params(key, emb_dim, hidden_dim, dtype=jnp.float32):
    """Deterministic init mimicking nn.Linear (uniform +/- 1/sqrt(fan_in)).
    Weights stored as [in, out]; biases as [1, out]; w3 stored as a [1, H2] row."""
    h2 = hidden_dim // 2
    ks = jax.random.split(key, 6)

    def lin(kw, kb, fan_in, fan_out):
        bound = 1.0 / jnp.sqrt(fan_in)
        w = jax.random.uniform(kw, (fan_in, fan_out), jnp.float32, -bound, bound)
        b = jax.random.uniform(kb, (1, fan_out), jnp.float32, -bound, bound)
        return w.astype(dtype), b.astype(dtype)

    w1, b1 = lin(ks[0], ks[1], emb_dim, hidden_dim)
    w2, b2 = lin(ks[2], ks[3], hidden_dim, h2)
    w3, b3 = lin(ks[4], ks[5], h2, 1)
    return (w1, b1, w2, b2, w3.T, b3)   # w3.T -> [1, H2] row for the VPU reduction


def reference_forward(x, params, compute_dtype=None):
    """Plain-JAX reference mirroring the kernel's dtype handling
    (values rounded to compute_dtype, all math / accumulation in f32)."""
    w1, b1, w2, b2, w3, b3 = params
    x = x.reshape(x.shape[0], -1)
    if compute_dtype is not None:
        cast = lambda a: a.astype(compute_dtype)
        x, w1, b1, w2, b2, w3 = tuple(cast(a) for a in (x, w1, b1, w2, b2, w3))
    f32 = lambda a: a.astype(jnp.float32)
    hi = jax.lax.Precision.HIGHEST
    h1 = jnp.maximum(jnp.dot(f32(x), f32(w1), precision=hi) + f32(b1), 0.0)
    h2 = jnp.maximum(jnp.dot(h1, f32(w2), precision=hi) + f32(b2), 0.0)
    return jnp.sum(h2 * f32(w3), axis=-1) + f32(b3)[0, 0]


if __name__ == "__main__":
    # Small, module-consistent shapes: emb_dim=256, hidden_dim=32 (H2=16).
    EMB, HID = 256, 32
    key = jax.random.PRNGKey(0)
    kx, kp, kx2, kx3 = jax.random.split(key, 4)

    params = init_params(kp, EMB, HID)
    fwd = jax.jit(simple_dense_net_forward,
                  static_argnames=("tile_b", "compute_dtype"))

    # Default path: bf16 streaming, f32 accumulation.
    x = jax.random.normal(kx, (8, EMB), dtype=jnp.float32)
    logits = jax.block_until_ready(fwd(x, params))
    ref = reference_forward(x, params, compute_dtype=jnp.bfloat16)
    assert logits.shape == (8,)
    assert jnp.allclose(logits, ref, atol=2e-2, rtol=2e-2)

    # Pure f32 path (no boundary cast).
    logits32 = jax.block_until_ready(fwd(x, params, compute_dtype=None))
    ref32 = reference_forward(x, params, compute_dtype=None)
    assert logits32.shape == (8,)
    assert jnp.allclose(logits32, ref32, atol=2e-2, rtol=2e-2)

    # Ragged batch: 13 rows -> 2 tiles of 8, partial last block, no jnp.pad copy.
    x_ragged = jax.random.normal(kx2, (13, EMB), dtype=jnp.float32)
    logits_r = jax.block_until_ready(fwd(x_ragged, params))
    ref_r = reference_forward(x_ragged, params, compute_dtype=jnp.bfloat16)
    assert logits_r.shape == (13,)
    assert jnp.allclose(logits_r, ref_r, atol=2e-2, rtol=2e-2)

    # Tiny batch (< 8 rows): single full-dim block.
    x_tiny = jax.random.normal(kx3, (2, EMB), dtype=jnp.float32)
    logits_t = jax.block_until_ready(fwd(x_tiny, params))
    ref_t = reference_forward(x_tiny, params, compute_dtype=jnp.bfloat16)
    assert logits_t.shape == (2,)
    assert jnp.allclose(logits_t, ref_t, atol=2e-2, rtol=2e-2)

    print("KERNEL_OK")
</pallas_src>

<mosaic_0001>
module attributes {stable_mosaic.version = 11 : i64} {
  func.func @_mlp_kernel(%arg0: i32, %arg1: memref<8x256xbf16, #tpu.memory_space<vmem>>, %arg2: memref<256x32xbf16, #tpu.memory_space<vmem>>, %arg3: memref<1x32xbf16, #tpu.memory_space<vmem>>, %arg4: memref<32x16xbf16, #tpu.memory_space<vmem>>, %arg5: memref<1x16xbf16, #tpu.memory_space<vmem>>, %arg6: memref<1x16xbf16, #tpu.memory_space<vmem>>, %arg7: memref<1x1xf32, #tpu.memory_space<smem>>, %arg8: memref<8x1xf32, #tpu.memory_space<vmem>>) attributes {dimension_semantics = [#tpu.dimension_semantics<parallel>], iteration_bounds = array<i64: 1>, scalar_prefetch = 0 : i64, scratch_operands = 0 : i64, tpu.core_type = #tpu.core_type<tc>, window_params = [{transform_indices = @transform_0, window_bounds = array<i64: 8, 256>}, {pipeline_mode = #tpu.pipeline_mode<synchronous>, transform_indices = @transform_1, window_bounds = array<i64: 256, 32>}, {pipeline_mode = #tpu.pipeline_mode<synchronous>, transform_indices = @transform_2, window_bounds = array<i64: 1, 32>}, {pipeline_mode = #tpu.pipeline_mode<synchronous>, transform_indices = @transform_3, window_bounds = array<i64: 32, 16>}, {pipeline_mode = #tpu.pipeline_mode<synchronous>, transform_indices = @transform_4, window_bounds = array<i64: 1, 16>}, {pipeline_mode = #tpu.pipeline_mode<synchronous>, transform_indices = @transform_5, window_bounds = array<i64: 1, 16>}, {transform_indices = @transform_6, window_bounds = array<i64: 1, 1>}, {transform_indices = @transform_7, window_bounds = array<i64: 8, 1>}]} {
    %c0 = arith.constant 0 : index
    %c0_0 = arith.constant 0 : index
    %0 = vector.load %arg1[%c0, %c0_0] : memref<8x256xbf16, #tpu.memory_space<vmem>>, vector<8x256xbf16>
    %c0_1 = arith.constant 0 : index
    %c0_2 = arith.constant 0 : index
    %1 = vector.load %arg2[%c0_1, %c0_2] : memref<256x32xbf16, #tpu.memory_space<vmem>>, vector<256x32xbf16>
    %cst = arith.constant dense<0.000000e+00> : vector<8x32xf32>
    %2 = tpu.matmul %0, %1, %cst {dimension_numbers = #tpu.dot_dimension_numbers<[1], [0], [0], [1], [0, 0, 1, 1], [], []>} : vector<8x256xbf16>, vector<256x32xbf16>, vector<8x32xf32> -> vector<8x32xf32>
    %c0_3 = arith.constant 0 : index
    %c0_4 = arith.constant 0 : index
    %3 = vector.load %arg3[%c0_3, %c0_4] : memref<1x32xbf16, #tpu.memory_space<vmem>>, vector<1x32xbf16>
    %4 = arith.extf %3 : vector<1x32xbf16> to vector<1x32xf32>
    %5 = vector.broadcast %4 : vector<1x32xf32> to vector<8x32xf32>
    %6 = arith.addf %2, %5 : vector<8x32xf32>
    %cst_5 = arith.constant 0.000000e+00 : f32
    %7 = vector.broadcast %cst_5 : f32 to vector<8x32xf32>
    %8 = arith.maximumf %6, %7 : vector<8x32xf32>
    %c0_6 = arith.constant 0 : index
    %c0_7 = arith.constant 0 : index
    %9 = vector.load %arg4[%c0_6, %c0_7] : memref<32x16xbf16, #tpu.memory_space<vmem>>, vector<32x16xbf16>
    %10 = arith.extf %9 : vector<32x16xbf16> to vector<32x16xf32>
    %cst_8 = arith.constant dense<0.000000e+00> : vector<8x16xf32>
    %11 = tpu.matmul %8, %10, %cst_8 {dimension_numbers = #tpu.dot_dimension_numbers<[1], [0], [0], [1], [0, 0, 1, 1], [], []>} : vector<8x32xf32>, vector<32x16xf32>, vector<8x16xf32> -> vector<8x16xf32>
    %c0_9 = arith.constant 0 : index
    %c0_10 = arith.constant 0 : index
    %12 = vector.load %arg5[%c0_9, %c0_10] : memref<1x16xbf16, #tpu.memory_space<vmem>>, vector<1x16xbf16>
    %13 = arith.extf %12 : vector<1x16xbf16> to vector<1x16xf32>
    %14 = vector.broadcast %13 : vector<1x16xf32> to vector<8x16xf32>
    %15 = arith.addf %11, %14 : vector<8x16xf32>
    %cst_11 = arith.constant 0.000000e+00 : f32
    %16 = vector.broadcast %cst_11 : f32 to vector<8x16xf32>
    %17 = arith.maximumf %15, %16 : vector<8x16xf32>
    %c0_12 = arith.constant 0 : index
    %c0_13 = arith.constant 0 : index
    %18 = vector.load %arg6[%c0_12, %c0_13] : memref<1x16xbf16, #tpu.memory_space<vmem>>, vector<1x16xbf16>
    %19 = arith.extf %18 : vector<1x16xbf16> to vector<1x16xf32>
    %20 = vector.broadcast %19 : vector<1x16xf32> to vector<8x16xf32>
    %21 = arith.mulf %17, %20 : vector<8x16xf32>
    %cst_14 = arith.constant dense<0.000000e+00> : vector<8xf32>
    %22 = vector.multi_reduction <add>, %21, %cst_14 [1] : vector<8x16xf32> to vector<8xf32>
    %23 = vector.shape_cast %22 : vector<8xf32> to vector<8x1xf32>
    %c0_15 = arith.constant 0 : index
    %c0_16 = arith.constant 0 : index
    %24 = memref.load %arg7[%c0_15, %c0_16] : memref<1x1xf32, #tpu.memory_space<smem>>
    %25 = vector.broadcast %24 : f32 to vector<8x1xf32>
    %26 = arith.addf %23, %25 : vector<8x1xf32>
    %c0_17 = arith.constant 0 : index
    %c0_18 = arith.constant 0 : index
    %27 = vector.load %arg8[%c0_17, %c0_18] : memref<8x1xf32, #tpu.memory_space<vmem>>, vector<8x1xf32>
    tpu.vector_store %arg8[%c0_17, %c0_18], %26 {strides = array<i32>} : memref<8x1xf32, #tpu.memory_space<vmem>>, vector<8x1xf32>,
    return
  }
  func.func @transform_0(%arg0: i32) -> (i32, i32) {
    %c0_i32 = arith.constant 0 : i32
    %c0_i32_0 = arith.constant 0 : i32
    return %arg0, %c0_i32 : i32, i32
  }
  func.func @transform_1(%arg0: i32) -> (i32, i32) {
    %c0_i32 = arith.constant 0 : i32
    %c0_i32_0 = arith.constant 0 : i32
    %c0_i32_1 = arith.constant 0 : i32
    return %c0_i32, %c0_i32_0 : i32, i32
  }
  func.func @transform_2(%arg0: i32) -> (i32, i32) {
    %c0_i32 = arith.constant 0 : i32
    %c0_i32_0 = arith.constant 0 : i32
    %c0_i32_1 = arith.constant 0 : i32
    return %c0_i32, %c0_i32_0 : i32, i32
  }
  func.func @transform_3(%arg0: i32) -> (i32, i32) {
    %c0_i32 = arith.constant 0 : i32
    %c0_i32_0 = arith.constant 0 : i32
    %c0_i32_1 = arith.constant 0 : i32
    return %c0_i32, %c0_i32_0 : i32, i32
  }
  func.func @transform_4(%arg0: i32) -> (i32, i32) {
    %c0_i32 = arith.constant 0 : i32
    %c0_i32_0 = arith.constant 0 : i32
    %c0_i32_1 = arith.constant 0 : i32
    return %c0_i32, %c0_i32_0 : i32, i32
  }
  func.func @transform_5(%arg0: i32) -> (i32, i32) {
    %c0_i32 = arith.constant 0 : i32
    %c0_i32_0 = arith.constant 0 : i32
    %c0_i32_1 = arith.constant 0 : i32
    return %c0_i32, %c0_i32_0 : i32, i32
  }
  func.func @transform_6(%arg0: i32) -> (i32, i32) {
    %c0_i32 = arith.constant 0 : i32
    %c0_i32_0 = arith.constant 0 : i32
    %c0_i32_1 = arith.constant 0 : i32
    return %c0_i32, %c0_i32_0 : i32, i32
  }
  func.func @transform_7(%arg0: i32) -> (i32, i32) {
    %c0_i32 = arith.constant 0 : i32
    %c0_i32_0 = arith.constant 0 : i32
    return %arg0, %c0_i32 : i32, i32
  }
}

</mosaic_0001>

<bundles_post_ra>
// kernel: simple_dense_net_forward.1
= control target key start
LH: loop header
LB: loop body
LE: loop exit
PB: predicated region body
PF: predicated region fallthrough
CT: control target
= control target key end

     0   :  { %v406_v21 = vmov 0.0   ;;  %vm407_vm0 = vmmov 0   ;;  %v63_v26 = vlaneseq  ;;  %vm225_vm1 = vcmask 261120   ;;  %s520_s1 = inlined_call_operand.vmem [shape: bf16[256,32], index: 1, kind: input, shape index: {}]   ;;  %s521_s0 = inlined_call_operand.vmem [shape: bf16[8,256], index: 0, kind: input, shape index: {}]   ;;  %s522_s3 = inlined_call_operand.vmem [shape: bf16[32,16], index: 3, kind: input, shape index: {}]   ;;  %s523_s2 = inlined_call_operand.vmem [shape: bf16[1,32], index: 2, kind: input, shape index: {}]   ;;  %s524_s4 = inlined_call_operand.vmem [shape: bf16[1,16], index: 4, kind: input, shape index: {}]   ;;  %s525_s5 = inlined_call_operand.vmem [shape: bf16[1,16], index: 5, kind: input, shape index: {}]   ;;  %s526_s6 = inlined_call_operand.<no memory space> [shape: f32[1,1], index: 6, kind: input, shape index: {}]   ;;  %s527_s7 = inlined_call_operand.vmem [shape: f32[8,1], index: 7, kind: output, shape index: {}]  }
   0x1   :  { %v388_v0 = vld [vmem:[%s520_s1 + $0x78] sm:$0xff]   ;;  %v390_v2 = vld [vmem:[%s520_s1 + $0x70] sm:$0xff]   ;;  %v392_v4 = vld [vmem:[%s520_s1 + $0x68] sm:$0xff]   ;;  %375 = vmatprep.subr.mxu1 %v406_v21  ;;  %383 = vmatprep.mubr.msk.f32.mxu1 %vm407_vm0, %v406_v21  ;;  %vm307_vm2 = vcmask 130048   ;;  %v312_v51 = vstv %s526_s6  ;;  %vm314_vm3 = vcmask 7168  }
   0x2   :  { %v389_v1 = vld [vmem:[%s520_s1 + $0x38] sm:$0xff]   ;;  %348 = vmatprep.subr.bf16.mxu0 %v388_v0  ;;  %v391_v3 = vld [vmem:[%s520_s1 + $0x30] sm:$0xff]   ;;  %v393_v5 = vld [vmem:[%s520_s1 + $0x28] sm:$0xff]   ;;  %v64_v27 = vshrl.u32 %v63_v26, 7 }
   0x3   :  { %349 = vmatpush3.bf16.msra.mxu0 %v389_v1  ;;  %v394_v6 = vld [vmem:[%s520_s1 + $0x60] sm:$0xff]   ;;  %v396_v8 = vld [vmem:[%s520_s1 + $0x58] sm:$0xff]   ;;  %v398_v10 = vld [vmem:[%s520_s1 + $0x50] sm:$0xff]  }
   0x4   :  { %350 = vmatprep.subr.bf16.mxu0 %v390_v2  ;;  %v395_v7 = vld [vmem:[%s520_s1 + $0x20] sm:$0xff]   ;;  %v397_v9 = vld [vmem:[%s520_s1 + $0x18] sm:$0xff]   ;;  %v399_v13 = vld [vmem:[%s520_s1 + $0x10] sm:$0xff]   ;;  %v65_v30 = vsub.s32 0, %v64_v27 }
   0x5   :  { %v28_v11 = vld [vmem:[%s521_s0] sm:$0xff]  ;;  %v400_v14 = vld [vmem:[%s520_s1 + $0x48] sm:$0xff]  }
   0x6   :  { %v321_v12 = vcombine.high %v28_v11, %v28_v11  ;;  %v401_v15 = vld [vmem:[%s520_s1 + $0x8] sm:$0xff]   ;;  %v402_v16 = vld [vmem:[%s520_s1 + $0x40] sm:$0xff]   ;;  %v320_v18 = vcombine.low %v28_v11, %v28_v11 }
   0x7   :  { %351 = vmatpush3.bf16.msra.mxu0 %v391_v3  ;;  %v403_v17 = vld [vmem:[%s520_s1] sm:$0xff]   ;;  %v347_v19 = vld [vmem:[%s522_s3 + $0x8] sm:$0xff]  }
   0x8   :  { %352 = vmatprep.subr.bf16.mxu0 %v392_v4  ;;  %202 = vmatprep.mubr.bf16.mxu0 %v321_v12  ;;  %v346_v20 = vunpack.c.h.bf16 %v347_v19  ;;  %v345_v22 = vunpack.c.l.bf16 %v347_v19  ;;  %v340_v23 = vld [vmem:[%s522_s3] sm:$0xff]  }
   0x9   :  { %v342_v24 = vunpack.c.h.bf16 %v340_v23  ;;  %v341_v25 = vunpack.c.l.bf16 %v340_v23  ;;  %v61_v28 = vld [vmem:[%s523_s2] sm:$0x1] }
   0xa   :  { %376 = vmatpush3.msra.mxu1 %v346_v20  ;;  %v62_v29 = vunpack.c.l.bf16 %v61_v28  ;;  %v219_v39 = vld [vmem:[%s524_s4] sm:$0x1] }
   0xb   :  { %353 = vmatpush3.bf16.msra.mxu0 %v393_v5  ;;  %377 = vmatprep.subr.mxu1 %v406_v21  ;;  %v220_v40 = vunpack.c.l.bf16 %v219_v39  ;;  %v300_v41 = vld [vmem:[%s525_s5] sm:$0x1] }
   0xc   :  { %354 = vmatprep.subr.bf16.mxu0 %v394_v6  ;;  %378 = vmatpush3.msra.mxu1 %v345_v22  ;;  %v66_v32 = vrot.slane %v62_v29, %v65_v30  ;;  %v301_v43 = vunpack.c.l.bf16 %v300_v41 }
   0xd   :  { %379 = vmatprep.subr.mxu1 %v406_v21  ;;  %v224_v42 = vrot.slane %v220_v40, %v65_v30 }
   0xe   :  { %380 = vmatpush3.msra.mxu1 %v342_v24  ;;  %v305_v46 = vrot.slane %v301_v43, %v65_v30 }
   0xf   :  { %355 = vmatpush3.bf16.msra.mxu0 %v395_v7  ;;  %381 = vmatprep.subr.mxu1 %v406_v21 }
  0x10   :  { %356 = vmatprep.subr.bf16.mxu0 %v396_v8  ;;  %382 = vmatpush3.msra.mxu1 %v341_v25 }
  0x13   :  { %357 = vmatpush3.bf16.msra.mxu0 %v397_v9 }
  0x14   :  { %358 = vmatprep.subr.bf16.mxu0 %v398_v10 }
  0x17   :  { %359 = vmatpush3.bf16.msra.mxu0 %v399_v13 }
  0x18   :  { %360 = vmatprep.subr.bf16.mxu0 %v400_v14 }
  0x1b   :  { %361 = vmatpush3.bf16.msra.mxu0 %v401_v15 }
  0x1c   :  { %362 = vmatprep.subr.bf16.mxu0 %v402_v16 }
  0x1f   :  { %363 = vmatpush3.bf16.msra.mxu0 %v403_v17 }
  0x22   :  { %203 = vmatmul.mubr.bf16.vlgmr.msra.gmra.mxu0 %v320_v18 }
  0xe2   :  { %v364_v31 = vpop.f32.mrf.mxu0 }
  0xe4   :  { %v365_v33 = vpop.f32.mrf.mxu0 }
  0xe5   :  { %v366_v34 = vadd.f32 %v365_v33, %v364_v31 }
  0xe6   :  { %v367_v35 = vpop.f32.mrf.mxu0 }
  0xe7   :  { %v205_v36 = vadd.f32 %v366_v34, %v66_v32 }
  0xe8   :  { %v368_v37 = vpop.f32.mrf.mxu0 }
  0xe9   :  { %v210_v38 = vmax.f32 %v205_v36, 0.0 }
  0xeb   :  { %384 = vmatmul.mubr.msk.f32.vlgmr.msra.gmra.mxu1 %vm225_vm1, %v210_v38 }
 0x1ab   :  { %v295_v44 = vpop.f32.mrf.mxu1 }
 0x1ac   :  { %v296_v45 = vadd.f32 %v295_v44, %v224_v42 }
 0x1ad   :  { %v385_v47 = vpop.f32.mrf.mxu1 }
 0x1ae   :  { %v299_v48 = vmax.f32 %v296_v45, 0.0 }
 0x1b0   :  { %v306_v49 = vmul.f32 %v305_v46, %v299_v48 }
 0x1b2   :  { %v308_v50 = vsel %vm307_vm2, %v306_v49, 0.0 }
 0x1b3   :  { %309 = vadd.xlane.f32.xlu0 %v308_v50 }
 0x23c   :  { %v310_v52 = vpop.xlane.xlu0 %309 }
 0x23d   :  { %v313_v53 = vadd.f32 %v312_v51, %v310_v52 }
 0x23f   :  { %315 = vst.msk [vmem:[%s527_s7] sm:$0xff] %vm314_vm3, %v313_v53 }

</bundles_post_ra>
